<compile_context>
chip_gen: v7x
topology: tpu7x:2x2x1
jax: 0.10.0
libtpu: 0.0.40
codegen_flags: <defaults>
</compile_context>

<pallas_src>
import functools

import jax
import jax.numpy as jnp
from jax.experimental import pallas as pl
from jax.experimental.pallas import tpu as pltpu

EPS = 1e-5


def _conv_norm_act_kernel(x_ref, w_ref, m_ref, o_ref, *, k, wp):
    # x_ref: (C_in, FLAT)            bf16  flattened replicate-padded sample
    # w_ref: (k*k, C_out_tile, C_in) bf16  per-tap weight slices
    # m_ref: (1, L)                  f32   valid/(H*W) weights (0 on pad cols)
    # o_ref: (C_out_tile, L)         f32   L = H * Wp (lane dense)
    cot, l = o_ref.shape

    # Convolution: k*k accumulated MXU matmuls over lane-shifted input windows.
    acc = jnp.zeros((cot, l), jnp.float32)
    for kh in range(k):
        for kw in range(k):
            off = kh * wp + kw
            tap = x_ref[:, off:off + l]            # (C_in, L)  bf16
            wt = w_ref[kh * k + kw]                # (C_out_tile, C_in) bf16
            acc = acc + jnp.dot(wt, tap, preferred_element_type=jnp.float32)

    # InstanceNorm2d (no affine, biased variance, eps=1e-5): one-pass stats in
    # f32.  m_ref already masks the Wp-W overcompute columns and carries the
    # 1/(H*W) factor, so sum(acc*m) = mean and sum(acc^2*m) = E[y^2].
    m = m_ref[...]                                         # (1, L)
    mean = jnp.sum(acc * m, axis=1, keepdims=True)         # (C_out_tile, 1)
    e2 = jnp.sum((acc * acc) * m, axis=1, keepdims=True)   # (C_out_tile, 1)
    var = e2 - mean * mean
    y = (acc - mean) * jax.lax.rsqrt(var + EPS)

    # ReLU + lane-dense store.
    o_ref[...] = jnp.maximum(y, 0.0).astype(o_ref.dtype)


@functools.partial(jax.jit, static_argnames=("kernel_size",))
def conv_norm_activation(x, weight, *, kernel_size=3):
    """Forward pass of _ConvNormActivation.

    x:      (N, C_in, H, W)       float32, NCHW
    weight: (C_out, C_in, KH, KW) float32
    returns (N, C_out, H, W)      float32
    """
    n, c_in, h, w = x.shape
    c_out = weight.shape[0]
    k = kernel_size
    assert k % 2 == 1, "odd kernel size expected for 'same' padding"
    pad = k // 2
    hp, wp = h + 2 * pad, w + 2 * pad
    l = h * wp                       # overcomputed flat length per sample
    flat = hp * wp + (k - 1)         # max tap offset + L fits exactly

    # ---- cheap host-side glue (no im2col) ---------------------------------
    x_pad = jnp.pad(x, ((0, 0), (0, 0), (pad, pad), (pad, pad)), mode="edge")
    x_flat = x_pad.reshape(n, c_in, hp * wp)
    x_flat = jnp.pad(x_flat, ((0, 0), (0, 0), (0, k - 1)))          # tail pad
    x_flat = x_flat.astype(jnp.bfloat16)

    # weight (C_out, C_in, KH, KW) -> (K*K, C_out, C_in) per-tap slices.
    w_taps = jnp.transpose(weight, (2, 3, 0, 1)).reshape(k * k, c_out, c_in)
    w_taps = w_taps.astype(jnp.bfloat16)

    # Valid-column mask with the 1/(H*W) normalization folded in (f32).
    col = jnp.arange(l, dtype=jnp.int32) % wp
    mask = jnp.where(col < w, 1.0 / float(h * w), 0.0)
    mask = mask.astype(jnp.float32).reshape(1, l)

    # C_out tiling: gives a second parallel grid axis (v7x megacore) and bounds
    # the per-step VMEM footprint at realistic channel counts.
    if c_out > 128 and c_out % 128 == 0:
        c_out_tile = 128
    else:
        c_out_tile = c_out
    grid = (n, c_out // c_out_tile)

    out_flat = pl.pallas_call(
        functools.partial(_conv_norm_act_kernel, k=k, wp=wp),
        out_shape=jax.ShapeDtypeStruct((n, c_out, l), jnp.float32),
        grid_spec=pltpu.PrefetchScalarGridSpec(
            num_scalar_prefetch=0,
            grid=grid,
            in_specs=[
                # one sample's flat padded input; constant in j -> no re-DMA
                pl.BlockSpec((pl.Squeezed(), c_in, flat), lambda i, j: (i, 0, 0)),
                # per-tap weight slices for this C_out tile (tiny block)
                pl.BlockSpec((k * k, c_out_tile, c_in), lambda i, j: (0, j, 0)),
                # stats mask (shared)
                pl.BlockSpec((1, l), lambda i, j: (0, 0)),
            ],
            out_specs=pl.BlockSpec((pl.Squeezed(), c_out_tile, l),
                                   lambda i, j: (i, j, 0)),
        ),
        compiler_params=pltpu.CompilerParams(
            dimension_semantics=("parallel", "parallel"),
            vmem_limit_bytes=48 * 1024 * 1024,   # headroom under v7x's 64 MiB
        ),
    )(x_flat, w_taps, mask)

    # Crop the Wp-W overcompute columns: valid (h, w) lives at flat h*Wp + w.
    out = out_flat.reshape(n, c_out, h, wp)[:, :, :, :w]
    return out


def _reference_forward(x, weight):
    """Pure-JAX f32 reference mirroring PyTorch semantics."""
    k = weight.shape[-1]
    pad = k // 2
    x_pad = jnp.pad(x, ((0, 0), (0, 0), (pad, pad), (pad, pad)), mode="edge")
    y = jax.lax.conv_general_dilated(
        x_pad, weight, window_strides=(1, 1), padding="VALID",
        dimension_numbers=("NCHW", "OIHW", "NCHW"),
    )
    mean = y.mean(axis=(2, 3), keepdims=True)
    var = ((y - mean) ** 2).mean(axis=(2, 3), keepdims=True)
    return jnp.maximum((y - mean) / jnp.sqrt(var + EPS), 0.0)


if __name__ == "__main__":
    key = jax.random.PRNGKey(0)
    kx, kw = jax.random.split(key)

    N, C_IN, C_OUT, H, W, K = 2, 4, 8, 16, 16, 3

    x = jax.random.normal(kx, (N, C_IN, H, W), dtype=jnp.float32)
    fan_in = C_IN * K * K
    weight = jax.random.normal(kw, (C_OUT, C_IN, K, K), dtype=jnp.float32)
    weight = weight * (2.0 / fan_in) ** 0.5

    out = jax.block_until_ready(conv_norm_activation(x, weight, kernel_size=K))
    assert out.shape == (N, C_OUT, H, W), out.shape

    # Tight check: reference fed the same bf16-rounded conv operands the kernel
    # uses (bf16 products are exact; only f32 accumulation order differs).
    x_b = x.astype(jnp.bfloat16).astype(jnp.float32)
    w_b = weight.astype(jnp.bfloat16).astype(jnp.float32)
    ref_b = _reference_forward(x_b, w_b)
    err_b = float(jnp.max(jnp.abs(out - ref_b)))
    assert jnp.allclose(out, ref_b, atol=2e-3, rtol=2e-3), err_b

    # Loose sanity check against the true f32 reference (bf16 cast error only).
    ref_f = _reference_forward(x, weight)
    err_f = float(jnp.max(jnp.abs(out - ref_f)))
    assert jnp.allclose(out, ref_f, atol=6e-2, rtol=6e-2), err_f

    print("KERNEL_OK")
</pallas_src>

<mosaic_0001>
module attributes {stable_mosaic.version = 11 : i64} {
  func.func @_conv_norm_act_kernel(%arg0: i32, %arg1: i32, %arg2: memref<1x4x326xbf16, #tpu.memory_space<vmem>>, %arg3: memref<9x8x4xbf16, #tpu.memory_space<vmem>>, %arg4: memref<1x288xf32, #tpu.memory_space<vmem>>, %arg5: memref<1x8x288xf32, #tpu.memory_space<vmem>>) attributes {dimension_semantics = [#tpu.dimension_semantics<parallel>, #tpu.dimension_semantics<parallel>], iteration_bounds = array<i64: 2, 1>, scalar_prefetch = 0 : i64, scratch_operands = 0 : i64, tpu.core_type = #tpu.core_type<tc>, window_params = [{transform_indices = @transform_0, window_bounds = array<i64: 1, 4, 326>}, {transform_indices = @transform_1, window_bounds = array<i64: 9, 8, 4>}, {pipeline_mode = #tpu.pipeline_mode<synchronous>, transform_indices = @transform_2, window_bounds = array<i64: 1, 288>}, {transform_indices = @transform_3, window_bounds = array<i64: 1, 8, 288>}]} {
    %cst = arith.constant 0.000000e+00 : f32
    %0 = vector.broadcast %cst : f32 to vector<8x288xf32>
    %c0 = arith.constant 0 : index
    %c0_0 = arith.constant 0 : index
    %c0_1 = arith.constant 0 : index
    %1 = vector.load %arg2[%c0, %c0_0, %c0_1] : memref<1x4x326xbf16, #tpu.memory_space<vmem>>, vector<1x4x288xbf16>
    %2 = vector.shape_cast %1 : vector<1x4x288xbf16> to vector<4x288xbf16>
    %c0_2 = arith.constant 0 : index
    %c0_3 = arith.constant 0 : index
    %c0_4 = arith.constant 0 : index
    %3 = vector.load %arg3[%c0_2, %c0_3, %c0_4] : memref<9x8x4xbf16, #tpu.memory_space<vmem>>, vector<1x8x4xbf16>
    %4 = vector.shape_cast %3 : vector<1x8x4xbf16> to vector<8x4xbf16>
    %cst_5 = arith.constant dense<0.000000e+00> : vector<8x288xf32>
    %5 = tpu.matmul %4, %2, %cst_5 {dimension_numbers = #tpu.dot_dimension_numbers<[1], [0], [0], [1], [0, 0, 1, 1], [], []>} : vector<8x4xbf16>, vector<4x288xbf16>, vector<8x288xf32> -> vector<8x288xf32>
    %6 = arith.addf %0, %5 : vector<8x288xf32>
    %c0_6 = arith.constant 0 : index
    %c0_7 = arith.constant 0 : index
    %c1 = arith.constant 1 : index
    %7 = vector.load %arg2[%c0_6, %c0_7, %c1] : memref<1x4x326xbf16, #tpu.memory_space<vmem>>, vector<1x4x288xbf16>
    %8 = vector.shape_cast %7 : vector<1x4x288xbf16> to vector<4x288xbf16>
    %c1_8 = arith.constant 1 : index
    %c0_9 = arith.constant 0 : index
    %c0_10 = arith.constant 0 : index
    %9 = vector.load %arg3[%c1_8, %c0_9, %c0_10] : memref<9x8x4xbf16, #tpu.memory_space<vmem>>, vector<1x8x4xbf16>
    %10 = vector.shape_cast %9 : vector<1x8x4xbf16> to vector<8x4xbf16>
    %cst_11 = arith.constant dense<0.000000e+00> : vector<8x288xf32>
    %11 = tpu.matmul %10, %8, %cst_11 {dimension_numbers = #tpu.dot_dimension_numbers<[1], [0], [0], [1], [0, 0, 1, 1], [], []>} : vector<8x4xbf16>, vector<4x288xbf16>, vector<8x288xf32> -> vector<8x288xf32>
    %12 = arith.addf %6, %11 : vector<8x288xf32>
    %c0_12 = arith.constant 0 : index
    %c0_13 = arith.constant 0 : index
    %c2 = arith.constant 2 : index
    %13 = vector.load %arg2[%c0_12, %c0_13, %c2] : memref<1x4x326xbf16, #tpu.memory_space<vmem>>, vector<1x4x288xbf16>
    %14 = vector.shape_cast %13 : vector<1x4x288xbf16> to vector<4x288xbf16>
    %c2_14 = arith.constant 2 : index
    %c0_15 = arith.constant 0 : index
    %c0_16 = arith.constant 0 : index
    %15 = vector.load %arg3[%c2_14, %c0_15, %c0_16] : memref<9x8x4xbf16, #tpu.memory_space<vmem>>, vector<1x8x4xbf16>
    %16 = vector.shape_cast %15 : vector<1x8x4xbf16> to vector<8x4xbf16>
    %cst_17 = arith.constant dense<0.000000e+00> : vector<8x288xf32>
    %17 = tpu.matmul %16, %14, %cst_17 {dimension_numbers = #tpu.dot_dimension_numbers<[1], [0], [0], [1], [0, 0, 1, 1], [], []>} : vector<8x4xbf16>, vector<4x288xbf16>, vector<8x288xf32> -> vector<8x288xf32>
    %18 = arith.addf %12, %17 : vector<8x288xf32>
    %c0_18 = arith.constant 0 : index
    %c0_19 = arith.constant 0 : index
    %c18 = arith.constant 18 : index
    %19 = vector.load %arg2[%c0_18, %c0_19, %c18] : memref<1x4x326xbf16, #tpu.memory_space<vmem>>, vector<1x4x288xbf16>
    %20 = vector.shape_cast %19 : vector<1x4x288xbf16> to vector<4x288xbf16>
    %c3 = arith.constant 3 : index
    %c0_20 = arith.constant 0 : index
    %c0_21 = arith.constant 0 : index
    %21 = vector.load %arg3[%c3, %c0_20, %c0_21] : memref<9x8x4xbf16, #tpu.memory_space<vmem>>, vector<1x8x4xbf16>
    %22 = vector.shape_cast %21 : vector<1x8x4xbf16> to vector<8x4xbf16>
    %cst_22 = arith.constant dense<0.000000e+00> : vector<8x288xf32>
    %23 = tpu.matmul %22, %20, %cst_22 {dimension_numbers = #tpu.dot_dimension_numbers<[1], [0], [0], [1], [0, 0, 1, 1], [], []>} : vector<8x4xbf16>, vector<4x288xbf16>, vector<8x288xf32> -> vector<8x288xf32>
    %24 = arith.addf %18, %23 : vector<8x288xf32>
    %c0_23 = arith.constant 0 : index
    %c0_24 = arith.constant 0 : index
    %c19 = arith.constant 19 : index
    %25 = vector.load %arg2[%c0_23, %c0_24, %c19] : memref<1x4x326xbf16, #tpu.memory_space<vmem>>, vector<1x4x288xbf16>
    %26 = vector.shape_cast %25 : vector<1x4x288xbf16> to vector<4x288xbf16>
    %c4 = arith.constant 4 : index
    %c0_25 = arith.constant 0 : index
    %c0_26 = arith.constant 0 : index
    %27 = vector.load %arg3[%c4, %c0_25, %c0_26] : memref<9x8x4xbf16, #tpu.memory_space<vmem>>, vector<1x8x4xbf16>
    %28 = vector.shape_cast %27 : vector<1x8x4xbf16> to vector<8x4xbf16>
    %cst_27 = arith.constant dense<0.000000e+00> : vector<8x288xf32>
    %29 = tpu.matmul %28, %26, %cst_27 {dimension_numbers = #tpu.dot_dimension_numbers<[1], [0], [0], [1], [0, 0, 1, 1], [], []>} : vector<8x4xbf16>, vector<4x288xbf16>, vector<8x288xf32> -> vector<8x288xf32>
    %30 = arith.addf %24, %29 : vector<8x288xf32>
    %c0_28 = arith.constant 0 : index
    %c0_29 = arith.constant 0 : index
    %c20 = arith.constant 20 : index
    %31 = vector.load %arg2[%c0_28, %c0_29, %c20] : memref<1x4x326xbf16, #tpu.memory_space<vmem>>, vector<1x4x288xbf16>
    %32 = vector.shape_cast %31 : vector<1x4x288xbf16> to vector<4x288xbf16>
    %c5 = arith.constant 5 : index
    %c0_30 = arith.constant 0 : index
    %c0_31 = arith.constant 0 : index
    %33 = vector.load %arg3[%c5, %c0_30, %c0_31] : memref<9x8x4xbf16, #tpu.memory_space<vmem>>, vector<1x8x4xbf16>
    %34 = vector.shape_cast %33 : vector<1x8x4xbf16> to vector<8x4xbf16>
    %cst_32 = arith.constant dense<0.000000e+00> : vector<8x288xf32>
    %35 = tpu.matmul %34, %32, %cst_32 {dimension_numbers = #tpu.dot_dimension_numbers<[1], [0], [0], [1], [0, 0, 1, 1], [], []>} : vector<8x4xbf16>, vector<4x288xbf16>, vector<8x288xf32> -> vector<8x288xf32>
    %36 = arith.addf %30, %35 : vector<8x288xf32>
    %c0_33 = arith.constant 0 : index
    %c0_34 = arith.constant 0 : index
    %c36 = arith.constant 36 : index
    %37 = vector.load %arg2[%c0_33, %c0_34, %c36] : memref<1x4x326xbf16, #tpu.memory_space<vmem>>, vector<1x4x288xbf16>
    %38 = vector.shape_cast %37 : vector<1x4x288xbf16> to vector<4x288xbf16>
    %c6 = arith.constant 6 : index
    %c0_35 = arith.constant 0 : index
    %c0_36 = arith.constant 0 : index
    %39 = vector.load %arg3[%c6, %c0_35, %c0_36] : memref<9x8x4xbf16, #tpu.memory_space<vmem>>, vector<1x8x4xbf16>
    %40 = vector.shape_cast %39 : vector<1x8x4xbf16> to vector<8x4xbf16>
    %cst_37 = arith.constant dense<0.000000e+00> : vector<8x288xf32>
    %41 = tpu.matmul %40, %38, %cst_37 {dimension_numbers = #tpu.dot_dimension_numbers<[1], [0], [0], [1], [0, 0, 1, 1], [], []>} : vector<8x4xbf16>, vector<4x288xbf16>, vector<8x288xf32> -> vector<8x288xf32>
    %42 = arith.addf %36, %41 : vector<8x288xf32>
    %c0_38 = arith.constant 0 : index
    %c0_39 = arith.constant 0 : index
    %c37 = arith.constant 37 : index
    %43 = vector.load %arg2[%c0_38, %c0_39, %c37] : memref<1x4x326xbf16, #tpu.memory_space<vmem>>, vector<1x4x288xbf16>
    %44 = vector.shape_cast %43 : vector<1x4x288xbf16> to vector<4x288xbf16>
    %c7 = arith.constant 7 : index
    %c0_40 = arith.constant 0 : index
    %c0_41 = arith.constant 0 : index
    %45 = vector.load %arg3[%c7, %c0_40, %c0_41] : memref<9x8x4xbf16, #tpu.memory_space<vmem>>, vector<1x8x4xbf16>
    %46 = vector.shape_cast %45 : vector<1x8x4xbf16> to vector<8x4xbf16>
    %cst_42 = arith.constant dense<0.000000e+00> : vector<8x288xf32>
    %47 = tpu.matmul %46, %44, %cst_42 {dimension_numbers = #tpu.dot_dimension_numbers<[1], [0], [0], [1], [0, 0, 1, 1], [], []>} : vector<8x4xbf16>, vector<4x288xbf16>, vector<8x288xf32> -> vector<8x288xf32>
    %48 = arith.addf %42, %47 : vector<8x288xf32>
    %c0_43 = arith.constant 0 : index
    %c0_44 = arith.constant 0 : index
    %c38 = arith.constant 38 : index
    %49 = vector.load %arg2[%c0_43, %c0_44, %c38] : memref<1x4x326xbf16, #tpu.memory_space<vmem>>, vector<1x4x288xbf16>
    %50 = vector.shape_cast %49 : vector<1x4x288xbf16> to vector<4x288xbf16>
    %c8 = arith.constant 8 : index
    %c0_45 = arith.constant 0 : index
    %c0_46 = arith.constant 0 : index
    %51 = vector.load %arg3[%c8, %c0_45, %c0_46] : memref<9x8x4xbf16, #tpu.memory_space<vmem>>, vector<1x8x4xbf16>
    %52 = vector.shape_cast %51 : vector<1x8x4xbf16> to vector<8x4xbf16>
    %cst_47 = arith.constant dense<0.000000e+00> : vector<8x288xf32>
    %53 = tpu.matmul %52, %50, %cst_47 {dimension_numbers = #tpu.dot_dimension_numbers<[1], [0], [0], [1], [0, 0, 1, 1], [], []>} : vector<8x4xbf16>, vector<4x288xbf16>, vector<8x288xf32> -> vector<8x288xf32>
    %54 = arith.addf %48, %53 : vector<8x288xf32>
    %c0_48 = arith.constant 0 : index
    %c0_49 = arith.constant 0 : index
    %55 = vector.load %arg4[%c0_48, %c0_49] : memref<1x288xf32, #tpu.memory_space<vmem>>, vector<1x288xf32>
    %56 = vector.broadcast %55 : vector<1x288xf32> to vector<8x288xf32>
    %57 = arith.mulf %54, %56 : vector<8x288xf32>
    %cst_50 = arith.constant dense<0.000000e+00> : vector<8xf32>
    %58 = vector.multi_reduction <add>, %57, %cst_50 [1] : vector<8x288xf32> to vector<8xf32>
    %59 = vector.shape_cast %58 : vector<8xf32> to vector<8x1xf32>
    %60 = arith.mulf %54, %54 : vector<8x288xf32>
    %61 = vector.broadcast %55 : vector<1x288xf32> to vector<8x288xf32>
    %62 = arith.mulf %60, %61 : vector<8x288xf32>
    %cst_51 = arith.constant dense<0.000000e+00> : vector<8xf32>
    %63 = vector.multi_reduction <add>, %62, %cst_51 [1] : vector<8x288xf32> to vector<8xf32>
    %64 = vector.shape_cast %63 : vector<8xf32> to vector<8x1xf32>
    %65 = arith.mulf %59, %59 : vector<8x1xf32>
    %66 = arith.subf %64, %65 : vector<8x1xf32>
    %67 = vector.broadcast %59 : vector<8x1xf32> to vector<8x288xf32>
    %68 = arith.subf %54, %67 : vector<8x288xf32>
    %cst_52 = arith.constant 9.99999974E-6 : f32
    %69 = vector.broadcast %cst_52 : f32 to vector<8x1xf32>
    %70 = arith.addf %66, %69 : vector<8x1xf32>
    %71 = math.rsqrt %70 : vector<8x1xf32>
    %72 = vector.broadcast %71 : vector<8x1xf32> to vector<8x288xf32>
    %73 = arith.mulf %68, %72 : vector<8x288xf32>
    %cst_53 = arith.constant 0.000000e+00 : f32
    %74 = vector.broadcast %cst_53 : f32 to vector<8x288xf32>
    %75 = arith.maximumf %73, %74 : vector<8x288xf32>
    %c0_54 = arith.constant 0 : index
    %c0_55 = arith.constant 0 : index
    %c0_56 = arith.constant 0 : index
    %76 = vector.load %arg5[%c0_54, %c0_55, %c0_56] : memref<1x8x288xf32, #tpu.memory_space<vmem>>, vector<1x8x288xf32>
    %77 = vector.shape_cast %76 : vector<1x8x288xf32> to vector<8x288xf32>
    %78 = vector.shape_cast %75 : vector<8x288xf32> to vector<1x8x288xf32>
    tpu.vector_store %arg5[%c0_54, %c0_55, %c0_56], %78 {strides = array<i32>} : memref<1x8x288xf32, #tpu.memory_space<vmem>>, vector<1x8x288xf32>,
    return
  }
  func.func @transform_0(%arg0: i32, %arg1: i32) -> (i32, i32, i32) {
    %c0_i32 = arith.constant 0 : i32
    %c0_i32_0 = arith.constant 0 : i32
    %c0_i32_1 = arith.constant 0 : i32
    return %arg0, %c0_i32, %c0_i32_0 : i32, i32, i32
  }
  func.func @transform_1(%arg0: i32, %arg1: i32) -> (i32, i32, i32) {
    %c0_i32 = arith.constant 0 : i32
    %c0_i32_0 = arith.constant 0 : i32
    %c0_i32_1 = arith.constant 0 : i32
    return %c0_i32, %arg1, %c0_i32_0 : i32, i32, i32
  }
  func.func @transform_2(%arg0: i32, %arg1: i32) -> (i32, i32) {
    %c0_i32 = arith.constant 0 : i32
    %c0_i32_0 = arith.constant 0 : i32
    %c0_i32_1 = arith.constant 0 : i32
    return %c0_i32, %c0_i32_0 : i32, i32
  }
  func.func @transform_3(%arg0: i32, %arg1: i32) -> (i32, i32, i32) {
    %c0_i32 = arith.constant 0 : i32
    %c0_i32_0 = arith.constant 0 : i32
    return %arg0, %arg1, %c0_i32 : i32, i32, i32
  }
}

</mosaic_0001>

<bundles_post_ra>
// kernel: conv_norm_activation.1
= control target key start
LH: loop header
LB: loop body
LE: loop exit
PB: predicated region body
PF: predicated region fallthrough
CT: control target
= control target key end

     0   :  { %s1741_s12 = smov 0   ;;  %s1743_s13 = smov 0   ;;  %s1940_s0 = inlined_call_operand.vmem [shape: bf16[2,4,326], index: 0, kind: input, shape index: {}]   ;;  %s1941_s1 = inlined_call_operand.vmem [shape: bf16[9,8,4], index: 1, kind: input, shape index: {}]   ;;  %s1942_s2 = inlined_call_operand.vmem [shape: f32[1,288], index: 2, kind: input, shape index: {}]   ;;  %s1943_s3 = inlined_call_operand.vmem [shape: f32[2,8,288], index: 3, kind: output, shape index: {}]  }
   0x1   :  { %s1745_s14 = smov 0  }
   0x2 LB: > { %s25_s15 = sadd.s32 1, %s1703_s13  ;;  %p1461_p0 = scmp.ge.s32.totalorder %s1707_s14, 1  ;;  %s1707_s14 = sphi %s1745_s14, %s13_s14   ;;  %s1703_s13 = sphi %s1743_s13, %s1945_s13   ;;  %s1699_s12 = sphi %s1741_s12, %s1944_s12  }
   0x3   : > { %p27_p1 = scmp.ge.s32.totalorder %s25_s15, 2  ;;  %p160_p2 = scmp.lt.s32.totalorder %s1707_s14, 3 }
   0x5   : > { %s1947_s15 = smov (%p27_p1, %s25_s15), 0  ;;  %p161_p3 = pnand %p1461_p0, %p160_p2 }
   0x6   : > { %p192_p4 = scmp.lt.s32.totalorder (!%p161_p3), %s1699_s12, 1  ;;  %v220_v0 = vlaneseq (!%p161_p3)  ;;  %v1709_v1 = vmov (!%p161_p3), 1983009808   ;;  %v1710_v3 = vmov (!%p161_p3), 0.0   ;;  %vm1711_vm0 = vmmov (!%p161_p3), 0   ;;  %s1713_s20 = smov (!%p161_p3), 127  }
   0x7   : > { %164 = sbr.rel (%p161_p3) target bundleno = 625 (0x271), region = 32  ;;  %v218_v2 = vunpack.c.l.s4 (!%p161_p3), %v1709_v1  ;;  %1519 = vmatprep.subr.bf16.mxu1 (!%p161_p3), %v1710_v3  ;;  %1521 = vmatprep.mubr.msk.bf16.mxu1 (!%p161_p3), %vm1711_vm0, %v1710_v3  ;;  %v1712_v6 = vmov (!%p161_p3), 0   ;;  %s1714_s21 = smov (!%p161_p3), 126   ;;  %vm245_vm1 = vcmask (!%p161_p3), 1041408   ;;  %vm238_vm2 = vcmask (!%p161_p3), 1039360  }
   0x8   : > { %v1762_v4 = vshrl.u32 (!%p161_p3), %v220_v0, 7  ;;  %287 = vmatprep.mubr.bf16.mxu0 (!%p161_p3), %v1712_v6  ;;  %s1715_s22 = smov (!%p161_p3), 110   ;;  %s1716_s23 = smov (!%p161_p3), 109   ;;  %v1464_v52 = vld [vmem:[%s1941_s1 + $0x4] sm:$0xf] (!%p161_p3)  ;;  %vm241_vm3 = vcmask (!%p161_p3), 31744  }
   0x9   : > { %v219_v5 = vunpack.c.0.s8 (!%p161_p3), %v218_v2  ;;  %s1717_s24 = smov (!%p161_p3), 108   ;;  %s1718_s25 = smov (!%p161_p3), 92   ;;  %vm455_vm4 = vcmask (!%p161_p3), 1031168   ;;  %v212_v63 = vld [vmem:[%s1941_s1] sm:$0xf] (!%p161_p3)  ;;  %vm580_vm5 = vcmask (!%p161_p3), 900096  }
   0xa   : > { %s1719_s26 = smov (!%p161_p3), 91   ;;  %s1720_s27 = smov (!%p161_p3), 90   ;;  %vm705_vm6 = vcmask (!%p161_p3), 891904   ;;  %vm830_vm7 = vcmask (!%p161_p3), 883712   ;;  %vm955_vm8 = vcmask (!%p161_p3), 752640   ;;  %vm1080_vm9 = vcmask (!%p161_p3), 744448  }
   0xb   : > { %v1769_v7 = vsub.s32 (!%p161_p3), %v219_v5, %v1762_v4  ;;  %vm1205_vm10 = vcmask (!%p161_p3), 736256   ;;  %vm1325_vm11 = vcmask (!%p161_p3), 261120  }
   0xe   : > { %s1949_s12 = smov (!%p192_p4, %s1699_s12), 1 }
   0xf   : > { %s1637_s16 = smul.u32 6, %s1949_s12 }
  0x11   : > { %s1774_s19 = scalar_lea.vmem %s1940_s0, %s1637_s16 }
  0x12   : > { %v211_v8 = vld [vmem:[%s1774_s19] sm:$0x3f] }
  0x13   : > { %v1778_v9 = vrot.slane %v211_v8, %v1769_v7  ;;  %v216_v10 = vcombine.high %v211_v8, %v211_v8  ;;  %v429_v11 = vld [vmem:[%s1774_s19] sm:$0x3f] }
  0x14   : > { %v440_v14 = vrot.slane %v429_v11, %v1769_v7  ;;  %v433_v15 = vcombine.high %v429_v11, %v429_v11  ;;  %v554_v17 = vld [vmem:[%s1774_s19] sm:$0x3f] }
  0x15   : > { %232 = vrot.lane.b32.xlu0 %v1778_v9, %s1713_s20  ;;  %v1783_v12 = vrot.slane %v216_v10, %v1769_v7  ;;  %v1787_v13 = vcombine.high %v1778_v9, %v1778_v9  ;;  %v565_v19 = vrot.slane %v554_v17, %v1769_v7  ;;  %v558_v20 = vcombine.high %v554_v17, %v554_v17  ;;  %v679_v22 = vld [vmem:[%s1774_s19] sm:$0x3f]  ;;  %v1471_v10 = vld [vmem:[%s1941_s1 + $0x8] sm:$0xf] }
  0x16   : > { %v448_v16 = vcombine.high %v440_v14, %v440_v14  ;;  %v447_v18 = vrot.slane %v433_v15, %v1769_v7  ;;  %v690_v24 = vrot.slane %v679_v22, %v1769_v7  ;;  %v683_v25 = vcombine.high %v679_v22, %v679_v22  ;;  %v804_v27 = vld [vmem:[%s1774_s19] sm:$0x3f] }
  0x17   : > { %236 = vrot.lane.b32.xlu1 %v1783_v12, %s1713_s20  ;;  %v573_v21 = vcombine.high %v565_v19, %v565_v19  ;;  %v572_v23 = vrot.slane %v558_v20, %v1769_v7  ;;  %v815_v29 = vrot.slane %v804_v27, %v1769_v7  ;;  %v808_v30 = vcombine.high %v804_v27, %v804_v27  ;;  %v929_v32 = vld [vmem:[%s1774_s19] sm:$0x3f] }
  0x18   : > { %v698_v26 = vcombine.high %v690_v24, %v690_v24  ;;  %v697_v28 = vrot.slane %v683_v25, %v1769_v7  ;;  %v940_v34 = vrot.slane %v929_v32, %v1769_v7  ;;  %v933_v35 = vcombine.high %v929_v32, %v929_v32  ;;  %v1054_v37 = vld [vmem:[%s1774_s19] sm:$0x3f] }
  0x19   : > { %234 = vrot.lane.b32.xlu0 %v1787_v13, %s1713_s20  ;;  %v823_v31 = vcombine.high %v815_v29, %v815_v29  ;;  %v822_v33 = vrot.slane %v808_v30, %v1769_v7  ;;  %v1065_v39 = vrot.slane %v1054_v37, %v1769_v7  ;;  %v1058_v40 = vcombine.high %v1054_v37, %v1054_v37  ;;  %v1179_v42 = vld [vmem:[%s1774_s19] sm:$0x3f] }
  0x1a   : > { %v948_v36 = vcombine.high %v940_v34, %v940_v34  ;;  %v947_v38 = vrot.slane %v933_v35, %v1769_v7  ;;  %v1190_v44 = vrot.slane %v1179_v42, %v1769_v7  ;;  %v1183_v45 = vcombine.high %v1179_v42, %v1179_v42  ;;  %v1487_v42 = vld [vmem:[%s1941_s1 + $0x18] sm:$0xf] }
  0x1b   : > { %449 = vrot.lane.b32.xlu1 %v440_v14, %s1714_s21  ;;  %v1073_v41 = vcombine.high %v1065_v39, %v1065_v39  ;;  %v1072_v43 = vrot.slane %v1058_v40, %v1769_v7  ;;  %v346_v55 = vsel %vm245_vm1, %v1783_v12, 0  ;;  %v340_v58 = vsel %vm245_vm1, %v1778_v9, 0 }
  0x1c   : > { %v1198_v46 = vcombine.high %v1190_v44, %v1190_v44  ;;  %v1197_v47 = vrot.slane %v1183_v45, %v1769_v7 }
  0x1d   : > { %451 = vrot.lane.b32.xlu0 %v448_v16, %s1714_s21 }
  0x1f   : > { %453 = vrot.lane.b32.xlu1 %v447_v18, %s1714_s21  ;;  %v1475_v18 = vld [vmem:[%s1941_s1 + $0xc] sm:$0xf] }
  0x21   : > { %574 = vrot.lane.b32.xlu0 %v565_v19, %s1715_s22 }
  0x23   : > { %576 = vrot.lane.b32.xlu1 %v573_v21, %s1715_s22 }
  0x25   : > { %578 = vrot.lane.b32.xlu0 %v572_v23, %s1715_s22 }
  0x27   : > { %699 = vrot.lane.b32.xlu1 %v690_v24, %s1716_s23 }
  0x29   : > { %701 = vrot.lane.b32.xlu0 %v698_v26, %s1716_s23  ;;  %v1479_v26 = vld [vmem:[%s1941_s1 + $0x10] sm:$0xf] }
  0x2b   : > { %703 = vrot.lane.b32.xlu1 %v697_v28, %s1716_s23 }
  0x2d   : > { %824 = vrot.lane.b32.xlu0 %v815_v29, %s1717_s24 }
  0x2f   : > { %826 = vrot.lane.b32.xlu1 %v823_v31, %s1717_s24 }
  0x31   : > { %828 = vrot.lane.b32.xlu0 %v822_v33, %s1717_s24 }
  0x33   : > { %949 = vrot.lane.b32.xlu1 %v940_v34, %s1718_s25  ;;  %v1483_v34 = vld [vmem:[%s1941_s1 + $0x14] sm:$0xf] }
  0x35   : > { %951 = vrot.lane.b32.xlu0 %v948_v36, %s1718_s25 }
  0x37   : > { %953 = vrot.lane.b32.xlu1 %v947_v38, %s1718_s25  ;;  %s1638_s25 = smul.u32 24, %s1949_s12 }
  0x39   : > { %1074 = vrot.lane.b32.xlu0 %v1065_v39, %s1719_s26  ;;  %s209_s28 = scalar_lea.vmem %s1943_s3, %s1638_s25 }
  0x3b   : > { %1076 = vrot.lane.b32.xlu1 %v1073_v41, %s1719_s26 }
  0x3d   : > { %1078 = vrot.lane.b32.xlu0 %v1072_v43, %s1719_s26 }
  0x3f   : > { %1199 = vrot.lane.b32.xlu1 %v1190_v44, %s1720_s27 }
  0x41   : > { %1201 = vrot.lane.b32.xlu0 %v1198_v46, %s1720_s27 }
  0x43   : > { %1203 = vrot.lane.b32.xlu1 %v1197_v47, %s1720_s27 }
  0x87   : > { %v233_v48 = vpop.permute.xlu0 %232 }
  0x89   : > { %v237_v49 = vpop.permute.xlu1 %236 }
  0x8a   : > { %v253_v50 = vsel %vm245_vm1, %v237_v49, 0 }
  0x8b   : > { %v235_v51 = vpop.permute.xlu0 %234  ;;  %1520 = vmatpush3.bf16.msra.mxu1 %v253_v50 }
  0x8c   : > { %v240_v53 = vsel %vm238_vm2, %v235_v51, %v237_v49  ;;  %v239_v54 = vsel %vm238_vm2, %v233_v48, %v235_v51  ;;  %1525 = vmatprep.subr.bf16.mxu1 %v1710_v3  ;;  %v1491_v49 = vld [vmem:[%s1941_s1 + $0x1c] sm:$0xf] }
  0x8d   : > { %1465 = vmatprep.subr.msk.bf16.mxu0 %vm245_vm1, %v240_v53  ;;  %v247_v56 = vsel %vm245_vm1, %v239_v54, 0  ;;  %v450_v57 = vpop.permute.xlu1 %449  ;;  %v1495_v53 = vld [vmem:[%s1941_s1 + $0x20] sm:$0xf]  ;;  %v1316_v54 = vsub.s32 2, %v1762_v4 }
  0x8e   : > { %256 = vmatpush1.bf16.msra.mxu0 %v247_v56  ;;  %1522 = vmatmul.mubr.msk.bf16.vlgmr.msra.gmra.mrb[0].mxu1 %vm241_vm3, %v1464_v52  ;;  %v1312_v56 = vsub.s32 1, %v1762_v4 }
  0x8f   : > { %1468 = vmatprep.subr.msk.bf16.mxu0 %vm245_vm1, %v1787_v13  ;;  %1526 = vmatpush3.bf16.msra.mxu1 %v346_v55  ;;  %v452_v59 = vpop.permute.xlu0 %451  ;;  %v1308_v55 = vsub.s32 0, %v1762_v4 }
  0x90   : > { %1527 = vmatprep.mubr.msk.bf16.mxu1 %vm1711_vm0, %v1710_v3  ;;  %1531 = vmatprep.subr.bf16.mxu1 %v1710_v3  ;;  %v456_v0 = vsel %vm455_vm4, %v450_v57, %v452_v59 }
  0x91   : > { %1466 = vmatmul.mubr.msk.bf16.vlgmr.msra.gmra.mrb[0].mxu0 %vm241_vm3, %v1464_v52  ;;  %v454_v60 = vpop.permute.xlu1 %453  ;;  %v462_v7 = vsel %vm245_vm1, %v456_v0, 0 }
  0x92   : > { %349 = vmatpush1.bf16.msra.mxu0 %v340_v58  ;;  %v457_v61 = vsel %vm455_vm4, %v452_v59, %v454_v60  ;;  %380 = vmatprep.mubr.bf16.mxu0 %v1712_v6  ;;  %v468_v1 = vsel %vm245_vm1, %v454_v60, 0 }
  0x93   : > { %1472 = vmatprep.subr.msk.bf16.mxu0 %vm245_vm1, %v457_v61  ;;  %v575_v62 = vpop.permute.xlu0 %574 }
  0x95   : > { %v577_v2 = vpop.permute.xlu1 %576 }
  0x96   : > { %v581_v11 = vsel %vm580_vm5, %v575_v62, %v577_v2 }
  0x97   : > { %v579_v5 = vpop.permute.xlu0 %578  ;;  %v587_v15 = vsel %vm245_vm1, %v581_v11, 0 }
  0x98   : > { %v582_v8 = vsel %vm580_vm5, %v577_v2, %v579_v5  ;;  %v593_v12 = vsel %vm245_vm1, %v579_v5, 0 }
  0x99   : > { %v700_v9 = vpop.permute.xlu1 %699 }
  0x9a   : > { %1528 = vmatmul.mubr.msk.bf16.vlgmr.msra.gmra.mrb[0].mxu1 %vm241_vm3, %v212_v63 }
  0x9b   : > { %1532 = vmatpush3.bf16.msra.mxu1 %v468_v1  ;;  %1533 = vmatprep.mubr.msk.bf16.mxu1 %vm1711_vm0, %v1710_v3  ;;  %v702_v13 = vpop.permute.xlu0 %701 }
  0x9c   : > { %1537 = vmatprep.subr.bf16.mxu1 %v1710_v3  ;;  %v706_v19 = vsel %vm705_vm6, %v700_v9, %v702_v13 }
  0x9d   : > { %1469 = vmatmul.mubr.msk.bf16.vlgmr.msra.gmra.mrb[0].mxu0 %vm241_vm3, %v212_v63  ;;  %v704_v14 = vpop.permute.xlu1 %703  ;;  %v712_v23 = vsel %vm245_vm1, %v706_v19, 0 }
  0x9e   : > { %471 = vmatpush1.bf16.msra.mxu0 %v462_v7  ;;  %502 = vmatprep.mubr.bf16.mxu0 %v1712_v6  ;;  %v707_v16 = vsel %vm705_vm6, %v702_v13, %v704_v14  ;;  %v718_v20 = vsel %vm245_vm1, %v704_v14, 0 }
  0x9f   : > { %1476 = vmatprep.subr.msk.bf16.mxu0 %vm245_vm1, %v582_v8  ;;  %v825_v17 = vpop.permute.xlu0 %824 }
  0xa1   : > { %v827_v21 = vpop.permute.xlu1 %826 }
  0xa2   : > { %v831_v27 = vsel %vm830_vm7, %v825_v17, %v827_v21 }
  0xa3   : > { %v829_v22 = vpop.permute.xlu0 %828  ;;  %v837_v31 = vsel %vm245_vm1, %v831_v27, 0 }
  0xa4   : > { %v832_v24 = vsel %vm830_vm7, %v827_v21, %v829_v22  ;;  %v843_v28 = vsel %vm245_vm1, %v829_v22, 0 }
  0xa5   : > { %v950_v25 = vpop.permute.xlu1 %949 }
  0xa6   : > { %1534 = vmatmul.mubr.msk.bf16.vlgmr.msra.gmra.mrb[0].mxu1 %vm241_vm3, %v1471_v10 }
  0xa7   : > { %1538 = vmatpush3.bf16.msra.mxu1 %v593_v12  ;;  %1539 = vmatprep.mubr.msk.bf16.mxu1 %vm1711_vm0, %v1710_v3  ;;  %v952_v29 = vpop.permute.xlu0 %951 }
  0xa8   : > { %1543 = vmatprep.subr.bf16.mxu1 %v1710_v3  ;;  %v956_v35 = vsel %vm955_vm8, %v950_v25, %v952_v29 }
  0xa9   : > { %1473 = vmatmul.mubr.msk.bf16.vlgmr.msra.gmra.mrb[0].mxu0 %vm241_vm3, %v1471_v10  ;;  %v954_v30 = vpop.permute.xlu1 %953  ;;  %v962_v39 = vsel %vm245_vm1, %v956_v35, 0 }
  0xaa   : > { %596 = vmatpush1.bf16.msra.mxu0 %v587_v15  ;;  %627 = vmatprep.mubr.bf16.mxu0 %v1712_v6  ;;  %v957_v32 = vsel %vm955_vm8, %v952_v29, %v954_v30  ;;  %v968_v36 = vsel %vm245_vm1, %v954_v30, 0 }
  0xab   : > { %1480 = vmatprep.subr.msk.bf16.mxu0 %vm245_vm1, %v707_v16  ;;  %v1075_v33 = vpop.permute.xlu0 %1074 }
  0xad   : > { %v1077_v37 = vpop.permute.xlu1 %1076 }
  0xae   : > { %v1081_v43 = vsel %vm1080_vm9, %v1075_v33, %v1077_v37 }
  0xaf   : > { %v1079_v38 = vpop.permute.xlu0 %1078  ;;  %v1087_v47 = vsel %vm245_vm1, %v1081_v43, 0 }
  0xb0   : > { %v1082_v40 = vsel %vm1080_vm9, %v1077_v37, %v1079_v38  ;;  %v1093_v44 = vsel %vm245_vm1, %v1079_v38, 0 }
  0xb1   : > { %v1200_v41 = vpop.permute.xlu1 %1199 }
  0xb2   : > { %1540 = vmatmul.mubr.msk.bf16.vlgmr.msra.gmra.mrb[0].mxu1 %vm241_vm3, %v1475_v18 }
  0xb3   : > { %1544 = vmatpush3.bf16.msra.mxu1 %v718_v20  ;;  %1545 = vmatprep.mubr.msk.bf16.mxu1 %vm1711_vm0, %v1710_v3  ;;  %v1202_v45 = vpop.permute.xlu0 %1201 }
  0xb4   : > { %1549 = vmatprep.subr.bf16.mxu1 %v1710_v3  ;;  %v1206_v50 = vsel %vm1205_vm10, %v1200_v41, %v1202_v45 }
  0xb5   : > { %1477 = vmatmul.mubr.msk.bf16.vlgmr.msra.gmra.mrb[0].mxu0 %vm241_vm3, %v1475_v18  ;;  %v1204_v46 = vpop.permute.xlu1 %1203  ;;  %v1212_v52 = vsel %vm245_vm1, %v1206_v50, 0 }
  0xb6   : > { %721 = vmatpush1.bf16.msra.mxu0 %v712_v23  ;;  %752 = vmatprep.mubr.bf16.mxu0 %v1712_v6  ;;  %v1207_v48 = vsel %vm1205_vm10, %v1202_v45, %v1204_v46  ;;  %v1218_v51 = vsel %vm245_vm1, %v1204_v46, 0 }
  0xb7   : > { %1484 = vmatprep.subr.msk.bf16.mxu0 %vm245_vm1, %v832_v24 }
  0xbe   : > { %1546 = vmatmul.mubr.msk.bf16.vlgmr.msra.gmra.mrb[0].mxu1 %vm241_vm3, %v1479_v26 }
  0xbf   : > { %1550 = vmatpush3.bf16.msra.mxu1 %v843_v28  ;;  %1551 = vmatprep.mubr.msk.bf16.mxu1 %vm1711_vm0, %v1710_v3 }
  0xc0   : > { %1555 = vmatprep.subr.bf16.mxu1 %v1710_v3 }
  0xc1   : > { %1481 = vmatmul.mubr.msk.bf16.vlgmr.msra.gmra.mrb[0].mxu0 %vm241_vm3, %v1479_v26 }
  0xc2   : > { %846 = vmatpush1.bf16.msra.mxu0 %v837_v31  ;;  %877 = vmatprep.mubr.bf16.mxu0 %v1712_v6 }
  0xc3   : > { %1488 = vmatprep.subr.msk.bf16.mxu0 %vm245_vm1, %v957_v32 }
  0xca   : > { %1552 = vmatmul.mubr.msk.bf16.vlgmr.msra.gmra.mrb[0].mxu1 %vm241_vm3, %v1483_v34 }
  0xcb   : > { %1556 = vmatpush3.bf16.msra.mxu1 %v968_v36  ;;  %1557 = vmatprep.mubr.msk.bf16.mxu1 %vm1711_vm0, %v1710_v3 }
  0xcc   : > { %1561 = vmatprep.subr.bf16.mxu1 %v1710_v3 }
  0xcd   : > { %1485 = vmatmul.mubr.msk.bf16.vlgmr.msra.gmra.mrb[0].mxu0 %vm241_vm3, %v1483_v34 }
  0xce   : > { %971 = vmatpush1.bf16.msra.mxu0 %v962_v39  ;;  %1002 = vmatprep.mubr.bf16.mxu0 %v1712_v6 }
  0xcf   : > { %1492 = vmatprep.subr.msk.bf16.mxu0 %vm245_vm1, %v1082_v40 }
  0xd6   : > { %1558 = vmatmul.mubr.msk.bf16.vlgmr.msra.gmra.mrb[0].mxu1 %vm241_vm3, %v1487_v42 }
  0xd7   : > { %1562 = vmatpush3.bf16.msra.mxu1 %v1093_v44  ;;  %1563 = vmatprep.mubr.msk.bf16.mxu1 %vm1711_vm0, %v1710_v3 }
  0xd8   : > { %1567 = vmatprep.subr.bf16.mxu1 %v1710_v3 }
  0xd9   : > { %1489 = vmatmul.mubr.msk.bf16.vlgmr.msra.gmra.mrb[0].mxu0 %vm241_vm3, %v1487_v42 }
  0xda   : > { %1096 = vmatpush1.bf16.msra.mxu0 %v1087_v47  ;;  %1127 = vmatprep.mubr.bf16.mxu0 %v1712_v6 }
  0xdb   : > { %1496 = vmatprep.subr.msk.bf16.mxu0 %vm245_vm1, %v1207_v48 }
  0xe2   : > { %1564 = vmatmul.mubr.msk.bf16.vlgmr.msra.gmra.mrb[0].mxu1 %vm241_vm3, %v1491_v49 }
  0xe3   : > { %1568 = vmatpush3.bf16.msra.mxu1 %v1218_v51  ;;  %1569 = vmatprep.mubr.msk.bf16.mxu1 %vm1711_vm0, %v1710_v3  ;;  %v1304_v3 = vld [vmem:[%s1942_s2] sm:$0x7] }
  0xe4   : > { %v1309_v58 = vrot.slane %v1304_v3, %v1308_v55  ;;  %v1313_v60 = vrot.slane %v1304_v3, %v1312_v56 }
  0xe5   : > { %1493 = vmatmul.mubr.msk.bf16.vlgmr.msra.gmra.mrb[0].mxu0 %vm241_vm3, %v1491_v49 }
  0xe6   : > { %1221 = vmatpush1.bf16.msra.mxu0 %v1212_v52  ;;  %1252 = vmatprep.mubr.bf16.mxu0 %v1712_v6  ;;  %v1317_v6 = vrot.slane %v1304_v3, %v1316_v54 }
  0xee   : > { %1570 = vmatmul.mubr.msk.bf16.vlgmr.msra.gmra.mrb[0].mxu1 %vm241_vm3, %v1495_v53 }
  0xf1   : > { %1497 = vmatmul.mubr.msk.bf16.vlgmr.msra.gmra.mrb[0].mxu0 %vm241_vm3, %v1495_v53 }
 0x1c1   : > { %v1295_v57 = vpop.f32.mrb[0].mxu1 }
 0x1c2   : > { %v1571_v59 = vpop.f32.mrb[1].mxu1  ;;  %v1332_v61 = vmul.f32 %v1295_v57, %v1295_v57  ;;  %v1323_v1 = vmul.f32 %v1317_v6, %v1295_v57 }
 0x1c3   : > { %v1298_v62 = vpop.f32.mrb[2].mxu1 }
 0x1c4   : > { %v1254_v63 = vpop.f32.mrb[0].mxu0  ;;  %v1572_v0 = vpop.f32.mrb[3].mxu1  ;;  %v1335_v4 = vmul.f32 %v1332_v61, %v1317_v6  ;;  %v1326_v15 = vsel %vm1325_vm11, %v1323_v1, 0.0 }
 0x1c5   : > { %v1321_v2 = vmul.f32 %v1309_v58, %v1254_v63  ;;  %v1330_v5 = vmul.f32 %v1254_v63, %v1254_v63  ;;  %v1256_v7 = vpop.f32.mrb[1].mxu0 }
 0x1c6   : > { %v1322_v8 = vmul.f32 %v1313_v60, %v1256_v7  ;;  %v1331_v9 = vmul.f32 %v1256_v7, %v1256_v7  ;;  %v1258_v10 = vpop.f32.mrb[2].mxu0  ;;  %v1337_v18 = vsel %vm1325_vm11, %v1335_v4, 0.0 }
 0x1c7   : > { %v1259_v11 = vpop.f32.mrb[3].mxu0  ;;  %v1333_v12 = vmul.f32 %v1330_v5, %v1309_v58 }
 0x1c8   : > { %v1324_v13 = vadd.f32 %v1322_v8, %v1321_v2  ;;  %v1334_v14 = vmul.f32 %v1331_v9, %v1313_v60 }
 0x1ca   : > { %v1327_v16 = vadd.f32 %v1326_v15, %v1324_v13  ;;  %v1336_v17 = vadd.f32 %v1334_v14, %v1333_v12 }
 0x1cc   : > { %1328 = vadd.xlane.f32.xlu0 %v1327_v16  ;;  %v1338_v19 = vadd.f32 %v1337_v18, %v1336_v17 }
 0x1ce   : > { %1339 = vadd.xlane.f32.xlu1 %v1338_v19 }
 0x259   : > { %v1329_v20 = vpop.xlane.xlu0 %1328 }
 0x25a   : > { %v1341_v21 = vmul.f32 %v1329_v20, %v1329_v20  ;;  %v1343_v25 = vsub.f32 %v1254_v63, %v1329_v20  ;;  %v1344_v26 = vsub.f32 %v1256_v7, %v1329_v20  ;;  %v1345_v27 = vsub.f32 %v1295_v57, %v1329_v20 }
 0x25b   : > { %v1340_v22 = vpop.xlane.xlu1 %1339 }
 0x25c   : > { %v1342_v23 = vsub.f32 %v1340_v22, %v1341_v21 }
 0x25e   : > { %v1346_v24 = vadd.f32 1e-05, %v1342_v23 }
 0x260   : > { %1683 = vrsqrt.f32 %v1346_v24 }
 0x26a   : > { %v1684_v28 = vpop.eup %1683 }
 0x26b   : > { %v1348_v29 = vmul.f32 %v1684_v28, %v1343_v25  ;;  %v1349_v30 = vmul.f32 %v1684_v28, %v1344_v26  ;;  %v1350_v31 = vmul.f32 %v1684_v28, %v1345_v27 }
 0x26d   : > { %v1351_v32 = vmax.f32 %v1348_v29, 0.0  ;;  %v1352_v33 = vmax.f32 %v1349_v30, 0.0  ;;  %v1353_v34 = vmax.f32 %v1350_v31, 0.0 }
 0x26f   : > { %1354 = vst [vmem:[%s209_s28] sm:$0xff] %v1351_v32  ;;  %1355 = vst [vmem:[%s209_s28 + $0x8] sm:$0xff] %v1352_v33 }
 0x270   : > { %1356 = vst.msk [vmem:[%s209_s28 + $0x10] sm:$0xff] %vm1325_vm11, %v1353_v34 }
 0x271 PF: > { %s13_s14 = sadd.s32 1, %s1707_s14   ;;  %s1944_s12 = smov %s1703_s13 }
 0x272   : > { %p10_p5 = scmp.ge.s32.totalorder %s13_s14, 4   ;;  %s1945_s13 = smov %s1947_s15 }
 0x274   :  { %12 = sbr.rel (!%p10_p5) target bundleno = 2 (0x2), region = 73 }

</bundles_post_ra>
